<compile_context>
chip_gen: v7x
topology: tpu7x:2x2x1
jax: 0.10.0
libtpu: 0.0.40
codegen_flags: <defaults>
</compile_context>

<pallas_src>
import functools

import jax
import jax.numpy as jnp
from jax.experimental import pallas as pl
from jax.experimental.pallas import tpu as pltpu

# --- PyTorch module dims (fixed by the spec) ---------------------------------
N_OBS = 256        # n_obs (input / reconstruction feature dim)
H1 = 400           # fc1 / fc3 hidden width
ZDIM = 20          # latent dim

# --- Lane-aligned padded dims used inside the kernel -------------------------
H1_PAD = 512       # 400 -> 512 (multiple of 128)
ZDIM_PAD = 128     # mu|logvar packed into a single 128-lane slab

BATCH = 8
REPARAM_STRENGTH = 1.0


def _round_up(x, m):
    return (x + m - 1) // m * m


def _vae_kernel(n_obs_pad,
                strength_ref,                      # (1,1) SMEM f32
                x_ref, eps_ref,                    # (TB, n_obs_pad) bf16, (TB, 128) bf16
                w1_ref, w2_ref, w3_ref, w4_ref,    # bf16 weights (resident)
                bias_ref,                          # (1, packed) f32 bias slab
                recon_ref, muvar_ref):             # (TB, n_obs_pad) bf16, (TB, 128) f32
    strength = strength_ref[0, 0]

    # Static, 128-aligned slices of the packed bias slab.
    o1 = H1_PAD
    o2 = o1 + ZDIM_PAD
    o3 = o2 + H1_PAD
    b1 = bias_ref[:, 0:o1]
    b2 = bias_ref[:, o1:o2]
    b3 = bias_ref[:, o2:o3]
    b4 = bias_ref[:, o3:o3 + n_obs_pad]

    # encode: h1 = relu(x @ W1 + b1)   (bf16 MXU operands, f32 accumulate)
    h1 = jnp.dot(x_ref[...], w1_ref[...], preferred_element_type=jnp.float32) + b1
    h1 = jnp.maximum(h1, 0.0)

    # fused fc21|fc22 onto one 128-lane slab: lanes [0,20)=mu, [20,40)=logvar.
    muvar = jnp.dot(h1.astype(jnp.bfloat16), w2_ref[...],
                    preferred_element_type=jnp.float32) + b2

    # Reparameterize without any cross-lane move:
    #   std = exp(0.5*logvar) lives at lanes [20,40) of exp(0.5*muvar); eps was
    #   pre-placed on those lanes by the wrapper; w3 rows [20,40) duplicate
    #   rows [0,20), so z = [mu | s*eps*std | 0] contracts to (mu + s*eps*std) @ w3.
    lane = jax.lax.broadcasted_iota(jnp.int32, muvar.shape, 1)
    std = jnp.exp(0.5 * muvar)
    noise = jnp.where((lane >= ZDIM) & (lane < 2 * ZDIM),
                      (strength * eps_ref[...].astype(jnp.float32)) * std,
                      0.0)
    z = jnp.where(lane < ZDIM, muvar, 0.0) + noise

    # decode: recon = relu(z @ W3 + b3) @ W4 + b4   (raw logits; spec has no sigmoid)
    h3 = jnp.dot(z.astype(jnp.bfloat16), w3_ref[...],
                 preferred_element_type=jnp.float32) + b3
    h3 = jnp.maximum(h3, 0.0)
    recon = jnp.dot(h3.astype(jnp.bfloat16), w4_ref[...],
                    preferred_element_type=jnp.float32) + b4

    recon_ref[...] = recon.astype(recon_ref.dtype)   # bf16 writeback (half bytes)
    muvar_ref[...] = muvar                           # single lane-dense f32 store


def pack_params(params):
    """Pad to lane-aligned dims, fuse fc21|fc22 into one 128-lane slab,
    duplicate fc3 rows for the roll-free reparameterization, cast weights to
    bf16, and pack all biases into a single f32 slab."""
    n_obs = params["w1"].shape[0]
    n_obs_pad = _round_up(n_obs, 128)

    def pad2(a, r, c):
        return jnp.pad(a, ((0, r - a.shape[0]), (0, c - a.shape[1])))

    w1 = pad2(params["w1"], n_obs_pad, H1_PAD).astype(jnp.bfloat16)
    # fc21|fc22 fused: mu -> lanes [0,20), logvar -> lanes [20,40), rest 0.
    w2 = pad2(jnp.concatenate([params["w21"], params["w22"]], axis=1),
              H1_PAD, ZDIM_PAD).astype(jnp.bfloat16)
    # fc3 with rows [20,40) duplicating rows [0,20):
    #   (mu on lanes [0,20)) @ w3 + (eps*std on lanes [20,40)) @ w3.
    w3 = pad2(jnp.concatenate([params["w3"], params["w3"]], axis=0),
              ZDIM_PAD, H1_PAD).astype(jnp.bfloat16)
    w4 = pad2(params["w4"], H1_PAD, n_obs_pad).astype(jnp.bfloat16)

    bias = jnp.concatenate(
        [pad2(params["b1"], 1, H1_PAD),
         pad2(jnp.concatenate([params["b21"], params["b22"]], axis=1), 1, ZDIM_PAD),
         pad2(params["b3"], 1, H1_PAD),
         pad2(params["b4"], 1, n_obs_pad)], axis=1).astype(jnp.float32)

    return dict(w1=w1, w2=w2, w3=w3, w4=w4, bias=bias,
                n_obs=n_obs, n_obs_pad=n_obs_pad)


def vae_forward(x, eps, packed, *, reparameterization_strength=1.0,
                batch_tile=None):
    """Pallas VAE forward. Returns (recon[bf16 logits], mu[f32], logvar[f32])."""
    n_obs = packed["n_obs"]
    n_obs_pad = packed["n_obs_pad"]

    # mirror torch's x.view(-1, x.shape[1])
    x = x.reshape(-1, x.shape[1])
    B = x.shape[0]

    # Batch tiling:
    #  * multiple of 16 rows (bf16 sublane packing),
    #  * up to 256 rows per tile (fills the MXU M dim on single-TC v5e/v6e and
    #    amortizes the ~0.35us/step grid overhead),
    #  * B > 256 always gives >= 2 tiles so dual-TC v7x splits the parallel axis.
    if batch_tile is None:
        tb = min(256, _round_up(B, 16))
    else:
        tb = max(16, _round_up(batch_tile, 16))
    b_pad = _round_up(B, tb)
    nb = b_pad // tb

    # bf16 cast fused with padding in one wrapper op (skipped entirely if the
    # shape already matches); halves the batch-proportional stream the kernel reads.
    xb = x.astype(jnp.bfloat16)
    if xb.shape != (b_pad, n_obs_pad):
        xb = jnp.pad(xb, ((0, b_pad - B), (0, n_obs_pad - n_obs)))
    # eps goes on lanes [20,40) to line up with std = exp(0.5*logvar).
    epsb = jnp.pad(eps.astype(jnp.bfloat16),
                   ((0, b_pad - B), (ZDIM, ZDIM_PAD - 2 * ZDIM)))
    strength = jnp.full((1, 1), reparameterization_strength, jnp.float32)
    bias_cols = packed["bias"].shape[1]

    recon_p, muvar_p = pl.pallas_call(
        functools.partial(_vae_kernel, n_obs_pad),
        out_shape=(
            jax.ShapeDtypeStruct((b_pad, n_obs_pad), jnp.bfloat16),   # recon
            jax.ShapeDtypeStruct((b_pad, ZDIM_PAD), jnp.float32),     # mu|logvar
        ),
        grid=(nb,),
        in_specs=[
            # runtime scalar in SMEM (no recompile when it changes)
            pl.BlockSpec((1, 1), lambda i: (0, 0),
                         memory_space=pltpu.MemorySpace.SMEM),
            # per-batch-tile activations (bf16)
            pl.BlockSpec((tb, n_obs_pad), lambda i: (i, 0)),
            pl.BlockSpec((tb, ZDIM_PAD), lambda i: (i, 0)),
            # weights / biases stay resident across batch tiles
            pl.BlockSpec((n_obs_pad, H1_PAD), lambda i: (0, 0)),
            pl.BlockSpec((H1_PAD, ZDIM_PAD), lambda i: (0, 0)),
            pl.BlockSpec((ZDIM_PAD, H1_PAD), lambda i: (0, 0)),
            pl.BlockSpec((H1_PAD, n_obs_pad), lambda i: (0, 0)),
            pl.BlockSpec((1, bias_cols), lambda i: (0, 0)),
        ],
        out_specs=(
            pl.BlockSpec((tb, n_obs_pad), lambda i: (i, 0)),
            pl.BlockSpec((tb, ZDIM_PAD), lambda i: (i, 0)),
        ),
        compiler_params=pltpu.CompilerParams(
            dimension_semantics=("parallel",)),
    )(strength, xb, epsb,
      packed["w1"], packed["w2"], packed["w3"], packed["w4"], packed["bias"])

    recon = recon_p[:B, :n_obs]          # bf16 logits (spec's decode has no sigmoid)
    mu = muvar_p[:B, :ZDIM]
    logvar = muvar_p[:B, ZDIM:2 * ZDIM]
    return recon, mu, logvar


def init_params(key, n_obs):
    """Deterministic synthetic parameters (PyTorch Linear shapes, transposed)."""
    ks = jax.random.split(key, 10)

    def linear(kw, kb, fan_in, fan_out):
        bound = 1.0 / jnp.sqrt(fan_in)
        w = jax.random.uniform(kw, (fan_in, fan_out), jnp.float32, -bound, bound)
        b = jax.random.uniform(kb, (1, fan_out), jnp.float32, -bound, bound)
        return w, b

    w1, b1 = linear(ks[0], ks[1], n_obs, H1)
    w21, b21 = linear(ks[2], ks[3], H1, ZDIM)
    w22, b22 = linear(ks[4], ks[5], H1, ZDIM)
    w3, b3 = linear(ks[6], ks[7], ZDIM, H1)
    w4, b4 = linear(ks[8], ks[9], H1, n_obs)
    return dict(w1=w1, b1=b1, w21=w21, b21=b21, w22=w22, b22=b22,
                w3=w3, b3=b3, w4=w4, b4=b4)


def vae_ref(x, eps, p, strength):
    """Pure-JAX f32 reference of the PyTorch forward."""
    h1 = jnp.maximum(x @ p["w1"] + p["b1"], 0.0)
    mu = h1 @ p["w21"] + p["b21"]
    logvar = h1 @ p["w22"] + p["b22"]
    std = jnp.exp(0.5 * logvar)
    z = mu + strength * eps * std
    h3 = jnp.maximum(z @ p["w3"] + p["b3"], 0.0)
    recon = h3 @ p["w4"] + p["b4"]
    return recon, mu, logvar


if __name__ == "__main__":
    key = jax.random.PRNGKey(0)
    k_x, k_eps, k_p = jax.random.split(key, 3)

    x = jax.random.normal(k_x, (BATCH, N_OBS), jnp.float32)
    # eps plays the role of torch.randn_like(std), supplied externally so the
    # kernel is deterministic given the same noise draw.
    # TODO(synk): torch draws the noise inside forward(); an in-kernel
    # pltpu.prng_* path would remove this input stream but break exact testing.
    eps = jax.random.normal(k_eps, (BATCH, ZDIM), jnp.float32)
    params = init_params(k_p, N_OBS)
    packed = pack_params(params)

    recon, mu, logvar = vae_forward(
        x, eps, packed, reparameterization_strength=REPARAM_STRENGTH)
    jax.block_until_ready((recon, mu, logvar))

    # Reference uses the same bf16-rounded noise the kernel streams from HBM.
    eps_k = eps.astype(jnp.bfloat16).astype(jnp.float32)
    r_ref, mu_ref, lv_ref = vae_ref(x, eps_k, params, REPARAM_STRENGTH)
    # bf16 MXU operands (f32 accumulation) + bf16 recon output: loosened tolerances.
    assert jnp.allclose(mu, mu_ref, atol=2e-2, rtol=2e-2)
    assert jnp.allclose(logvar, lv_ref, atol=2e-2, rtol=2e-2)
    assert jnp.allclose(recon.astype(jnp.float32), r_ref, atol=5e-2, rtol=5e-2)

    print("KERNEL_OK")
</pallas_src>

<mosaic_0001>
module attributes {stable_mosaic.version = 11 : i64} {
  func.func @_vae_kernel(%arg0: i32, %arg1: memref<1x1xf32, #tpu.memory_space<smem>>, %arg2: memref<16x256xbf16, #tpu.memory_space<vmem>>, %arg3: memref<16x128xbf16, #tpu.memory_space<vmem>>, %arg4: memref<256x512xbf16, #tpu.memory_space<vmem>>, %arg5: memref<512x128xbf16, #tpu.memory_space<vmem>>, %arg6: memref<128x512xbf16, #tpu.memory_space<vmem>>, %arg7: memref<512x256xbf16, #tpu.memory_space<vmem>>, %arg8: memref<1x1408xf32, #tpu.memory_space<vmem>>, %arg9: memref<16x256xbf16, #tpu.memory_space<vmem>>, %arg10: memref<16x128xf32, #tpu.memory_space<vmem>>) attributes {dimension_semantics = [#tpu.dimension_semantics<parallel>], iteration_bounds = array<i64: 1>, scalar_prefetch = 0 : i64, scratch_operands = 0 : i64, tpu.core_type = #tpu.core_type<tc>, window_params = [{transform_indices = @transform_0, window_bounds = array<i64: 1, 1>}, {transform_indices = @transform_1, window_bounds = array<i64: 16, 256>}, {transform_indices = @transform_2, window_bounds = array<i64: 16, 128>}, {pipeline_mode = #tpu.pipeline_mode<synchronous>, transform_indices = @transform_3, window_bounds = array<i64: 256, 512>}, {pipeline_mode = #tpu.pipeline_mode<synchronous>, transform_indices = @transform_4, window_bounds = array<i64: 512, 128>}, {pipeline_mode = #tpu.pipeline_mode<synchronous>, transform_indices = @transform_5, window_bounds = array<i64: 128, 512>}, {pipeline_mode = #tpu.pipeline_mode<synchronous>, transform_indices = @transform_6, window_bounds = array<i64: 512, 256>}, {pipeline_mode = #tpu.pipeline_mode<synchronous>, transform_indices = @transform_7, window_bounds = array<i64: 1, 1408>}, {transform_indices = @transform_8, window_bounds = array<i64: 16, 256>}, {transform_indices = @transform_9, window_bounds = array<i64: 16, 128>}]} {
    %c0 = arith.constant 0 : index
    %c0_0 = arith.constant 0 : index
    %0 = memref.load %arg1[%c0, %c0_0] : memref<1x1xf32, #tpu.memory_space<smem>>
    %c0_1 = arith.constant 0 : index
    %c0_2 = arith.constant 0 : index
    %1 = vector.load %arg8[%c0_1, %c0_2] : memref<1x1408xf32, #tpu.memory_space<vmem>>, vector<1x512xf32>
    %c0_3 = arith.constant 0 : index
    %c512 = arith.constant 512 : index
    %2 = vector.load %arg8[%c0_3, %c512] : memref<1x1408xf32, #tpu.memory_space<vmem>>, vector<1x128xf32>
    %c0_4 = arith.constant 0 : index
    %c640 = arith.constant 640 : index
    %3 = vector.load %arg8[%c0_4, %c640] : memref<1x1408xf32, #tpu.memory_space<vmem>>, vector<1x512xf32>
    %c0_5 = arith.constant 0 : index
    %c1152 = arith.constant 1152 : index
    %4 = vector.load %arg8[%c0_5, %c1152] : memref<1x1408xf32, #tpu.memory_space<vmem>>, vector<1x256xf32>
    %c0_6 = arith.constant 0 : index
    %c0_7 = arith.constant 0 : index
    %5 = vector.load %arg2[%c0_6, %c0_7] : memref<16x256xbf16, #tpu.memory_space<vmem>>, vector<16x256xbf16>
    %c0_8 = arith.constant 0 : index
    %c0_9 = arith.constant 0 : index
    %6 = vector.load %arg4[%c0_8, %c0_9] : memref<256x512xbf16, #tpu.memory_space<vmem>>, vector<256x512xbf16>
    %cst = arith.constant dense<0.000000e+00> : vector<16x512xf32>
    %7 = tpu.matmul %5, %6, %cst {dimension_numbers = #tpu.dot_dimension_numbers<[1], [0], [0], [1], [0, 0, 1, 1], [], []>} : vector<16x256xbf16>, vector<256x512xbf16>, vector<16x512xf32> -> vector<16x512xf32>
    %8 = vector.broadcast %1 : vector<1x512xf32> to vector<16x512xf32>
    %9 = arith.addf %7, %8 : vector<16x512xf32>
    %cst_10 = arith.constant 0.000000e+00 : f32
    %10 = vector.broadcast %cst_10 : f32 to vector<16x512xf32>
    %11 = arith.maximumf %9, %10 : vector<16x512xf32>
    %12 = arith.truncf %11 : vector<16x512xf32> to vector<16x512xbf16>
    %c0_11 = arith.constant 0 : index
    %c0_12 = arith.constant 0 : index
    %13 = vector.load %arg5[%c0_11, %c0_12] : memref<512x128xbf16, #tpu.memory_space<vmem>>, vector<512x128xbf16>
    %cst_13 = arith.constant dense<0.000000e+00> : vector<16x128xf32>
    %14 = tpu.matmul %12, %13, %cst_13 {dimension_numbers = #tpu.dot_dimension_numbers<[1], [0], [0], [1], [0, 0, 1, 1], [], []>} : vector<16x512xbf16>, vector<512x128xbf16>, vector<16x128xf32> -> vector<16x128xf32>
    %15 = vector.broadcast %2 : vector<1x128xf32> to vector<16x128xf32>
    %16 = arith.addf %14, %15 : vector<16x128xf32>
    %17 = tpu.iota {dimensions = array<i32: 1>} : vector<16x128xi32>
    %cst_14 = arith.constant 5.000000e-01 : f32
    %18 = vector.broadcast %cst_14 : f32 to vector<16x128xf32>
    %19 = arith.mulf %18, %16 : vector<16x128xf32>
    %20 = math.exp %19 : vector<16x128xf32>
    %c20_i32 = arith.constant 20 : i32
    %21 = vector.broadcast %c20_i32 : i32 to vector<16x128xi32>
    %22 = arith.cmpi sge, %17, %21 : vector<16x128xi32>
    %c40_i32 = arith.constant 40 : i32
    %23 = vector.broadcast %c40_i32 : i32 to vector<16x128xi32>
    %24 = arith.cmpi slt, %17, %23 : vector<16x128xi32>
    %25 = arith.andi %22, %24 : vector<16x128xi1>
    %c0_15 = arith.constant 0 : index
    %c0_16 = arith.constant 0 : index
    %26 = vector.load %arg3[%c0_15, %c0_16] : memref<16x128xbf16, #tpu.memory_space<vmem>>, vector<16x128xbf16>
    %27 = arith.extf %26 : vector<16x128xbf16> to vector<16x128xf32>
    %28 = vector.broadcast %0 : f32 to vector<16x128xf32>
    %29 = arith.mulf %28, %27 : vector<16x128xf32>
    %30 = arith.mulf %29, %20 : vector<16x128xf32>
    %cst_17 = arith.constant 0.000000e+00 : f32
    %31 = vector.broadcast %cst_17 : f32 to vector<16x128xf32>
    %32 = arith.select %25, %30, %31 : vector<16x128xi1>, vector<16x128xf32>
    %c20_i32_18 = arith.constant 20 : i32
    %33 = vector.broadcast %c20_i32_18 : i32 to vector<16x128xi32>
    %34 = arith.cmpi slt, %17, %33 : vector<16x128xi32>
    %cst_19 = arith.constant 0.000000e+00 : f32
    %35 = vector.broadcast %cst_19 : f32 to vector<16x128xf32>
    %36 = arith.select %34, %16, %35 : vector<16x128xi1>, vector<16x128xf32>
    %37 = arith.addf %36, %32 : vector<16x128xf32>
    %38 = arith.truncf %37 : vector<16x128xf32> to vector<16x128xbf16>
    %c0_20 = arith.constant 0 : index
    %c0_21 = arith.constant 0 : index
    %39 = vector.load %arg6[%c0_20, %c0_21] : memref<128x512xbf16, #tpu.memory_space<vmem>>, vector<128x512xbf16>
    %cst_22 = arith.constant dense<0.000000e+00> : vector<16x512xf32>
    %40 = tpu.matmul %38, %39, %cst_22 {dimension_numbers = #tpu.dot_dimension_numbers<[1], [0], [0], [1], [0, 0, 1, 1], [], []>} : vector<16x128xbf16>, vector<128x512xbf16>, vector<16x512xf32> -> vector<16x512xf32>
    %41 = vector.broadcast %3 : vector<1x512xf32> to vector<16x512xf32>
    %42 = arith.addf %40, %41 : vector<16x512xf32>
    %cst_23 = arith.constant 0.000000e+00 : f32
    %43 = vector.broadcast %cst_23 : f32 to vector<16x512xf32>
    %44 = arith.maximumf %42, %43 : vector<16x512xf32>
    %45 = arith.truncf %44 : vector<16x512xf32> to vector<16x512xbf16>
    %c0_24 = arith.constant 0 : index
    %c0_25 = arith.constant 0 : index
    %46 = vector.load %arg7[%c0_24, %c0_25] : memref<512x256xbf16, #tpu.memory_space<vmem>>, vector<512x256xbf16>
    %cst_26 = arith.constant dense<0.000000e+00> : vector<16x256xf32>
    %47 = tpu.matmul %45, %46, %cst_26 {dimension_numbers = #tpu.dot_dimension_numbers<[1], [0], [0], [1], [0, 0, 1, 1], [], []>} : vector<16x512xbf16>, vector<512x256xbf16>, vector<16x256xf32> -> vector<16x256xf32>
    %48 = vector.broadcast %4 : vector<1x256xf32> to vector<16x256xf32>
    %49 = arith.addf %47, %48 : vector<16x256xf32>
    %50 = arith.truncf %49 : vector<16x256xf32> to vector<16x256xbf16>
    %c0_27 = arith.constant 0 : index
    %c0_28 = arith.constant 0 : index
    %51 = vector.load %arg9[%c0_27, %c0_28] : memref<16x256xbf16, #tpu.memory_space<vmem>>, vector<16x256xbf16>
    tpu.vector_store %arg9[%c0_27, %c0_28], %50 {strides = array<i32>} : memref<16x256xbf16, #tpu.memory_space<vmem>>, vector<16x256xbf16>,
    %c0_29 = arith.constant 0 : index
    %c0_30 = arith.constant 0 : index
    %52 = vector.load %arg10[%c0_29, %c0_30] : memref<16x128xf32, #tpu.memory_space<vmem>>, vector<16x128xf32>
    tpu.vector_store %arg10[%c0_29, %c0_30], %16 {strides = array<i32>} : memref<16x128xf32, #tpu.memory_space<vmem>>, vector<16x128xf32>,
    return
  }
  func.func @transform_0(%arg0: i32) -> (i32, i32) {
    %c0_i32 = arith.constant 0 : i32
    %c0_i32_0 = arith.constant 0 : i32
    %c0_i32_1 = arith.constant 0 : i32
    return %c0_i32, %c0_i32_0 : i32, i32
  }
  func.func @transform_1(%arg0: i32) -> (i32, i32) {
    %c0_i32 = arith.constant 0 : i32
    %c0_i32_0 = arith.constant 0 : i32
    return %arg0, %c0_i32 : i32, i32
  }
  func.func @transform_2(%arg0: i32) -> (i32, i32) {
    %c0_i32 = arith.constant 0 : i32
    %c0_i32_0 = arith.constant 0 : i32
    return %arg0, %c0_i32 : i32, i32
  }
  func.func @transform_3(%arg0: i32) -> (i32, i32) {
    %c0_i32 = arith.constant 0 : i32
    %c0_i32_0 = arith.constant 0 : i32
    %c0_i32_1 = arith.constant 0 : i32
    return %c0_i32, %c0_i32_0 : i32, i32
  }
  func.func @transform_4(%arg0: i32) -> (i32, i32) {
    %c0_i32 = arith.constant 0 : i32
    %c0_i32_0 = arith.constant 0 : i32
    %c0_i32_1 = arith.constant 0 : i32
    return %c0_i32, %c0_i32_0 : i32, i32
  }
  func.func @transform_5(%arg0: i32) -> (i32, i32) {
    %c0_i32 = arith.constant 0 : i32
    %c0_i32_0 = arith.constant 0 : i32
    %c0_i32_1 = arith.constant 0 : i32
    return %c0_i32, %c0_i32_0 : i32, i32
  }
  func.func @transform_6(%arg0: i32) -> (i32, i32) {
    %c0_i32 = arith.constant 0 : i32
    %c0_i32_0 = arith.constant 0 : i32
    %c0_i32_1 = arith.constant 0 : i32
    return %c0_i32, %c0_i32_0 : i32, i32
  }
  func.func @transform_7(%arg0: i32) -> (i32, i32) {
    %c0_i32 = arith.constant 0 : i32
    %c0_i32_0 = arith.constant 0 : i32
    %c0_i32_1 = arith.constant 0 : i32
    return %c0_i32, %c0_i32_0 : i32, i32
  }
  func.func @transform_8(%arg0: i32) -> (i32, i32) {
    %c0_i32 = arith.constant 0 : i32
    %c0_i32_0 = arith.constant 0 : i32
    return %arg0, %c0_i32 : i32, i32
  }
  func.func @transform_9(%arg0: i32) -> (i32, i32) {
    %c0_i32 = arith.constant 0 : i32
    %c0_i32_0 = arith.constant 0 : i32
    return %arg0, %c0_i32 : i32, i32
  }
}

</mosaic_0001>

<bundles_post_ra>
// kernel: tpu_custom_call.1
= control target key start
LH: loop header
LB: loop body
LE: loop exit
PB: predicated region body
PF: predicated region fallthrough
CT: control target
= control target key end

     0   :  { %16 = vsyncpa [#allocation4], 0  ;;  %s2822_s0 = inlined_call_operand.<no memory space> [shape: f32[1,1], index: 0, kind: input, shape index: {}]   ;;  %s2823_s1 = inlined_call_operand.hbm [shape: bf16[16,256], index: 1, kind: input, shape index: {}]   ;;  %s2824_s2 = inlined_call_operand.hbm [shape: bf16[16,128], index: 2, kind: input, shape index: {}]   ;;  %s2825_s3 = inlined_call_operand.hbm [shape: bf16[256,512], index: 3, kind: input, shape index: {}]   ;;  %s2826_s4 = inlined_call_operand.hbm [shape: bf16[512,128], index: 4, kind: input, shape index: {}]   ;;  %s2827_s5 = inlined_call_operand.hbm [shape: bf16[128,512], index: 5, kind: input, shape index: {}]   ;;  %s2828_s6 = inlined_call_operand.hbm [shape: bf16[512,256], index: 6, kind: input, shape index: {}]   ;;  %s2829_s7 = inlined_call_operand.vmem [shape: f32[1,1408], index: 7, kind: input, shape index: {}]   ;;  %s2830_s8 = inlined_call_operand.hbm [shape: bf16[16,256], index: 8, kind: output, shape index: {0}]   ;;  %s2831_s9 = inlined_call_operand.hbm [shape: f32[16,128], index: 9, kind: output, shape index: {1}]  }
   0x1   :  { %17 = vsyncpa [#allocation7], 0 }
   0x2   :  { %18 = vsyncpa [#allocation10], 0 }
   0x3   :  { %19 = vsyncpa [#allocation13], 0 }
   0x4   :  { %20 = vsyncpa [#allocation5], 0 }
   0x5   :  { %21 = vsyncpa [#allocation16], 0  ;;  %s2590_s30 = smov [#allocation6]   ;;  %s2402_s13 = scalar_lea.hbm %s2824_s2, 128 }
   0x6   :  { %s41_s10 = sshll.u32 %s2590_s30, 4  ;;  %p2403_p0 = scmp.ne.s32.totalorder %s2824_s2, %s2402_s13  ;;  %s42_s10 = int_to_ptr.vmem [resolvable:$true] %s41_s10 }
   0x7   :  { %p2406_p1 = scmp.lt.u32.totalorder %s2402_s13, %s2824_s2 }
   0x9   :  { %p2408_p2 = pnand %p2406_p1, %p2403_p0 }
   0xb   :  { %2411 = shalt.err (!%p2408_p2)
}
   0xc   :  { %s2412_s18 = scalar_lea.vmem %s42_s10, 128  ;;  %p2417_p4 = scmp.lt.s32.totalorder %s42_s10, %s42_s10 }
   0xd   :  { %p2413_p3 = scmp.ne.s32.totalorder %s42_s10, %s2412_s18  ;;  %p2418_p5 = scmp.lt.s32.totalorder %s2412_s18, %s2412_s18 }
   0xf   :  { %p2419_p6 = por %p2418_p5, %p2417_p4 }
  0x11   :  { %p2420_p7 = pnand %p2419_p6, %p2413_p3 }
  0x13   :  { %2423 = shalt.err (!%p2420_p7)
}
  0x14   :  { %s2591_s19 = smov 64   ;;  %s2592_s20 = smov 4  }
  0x15   :  { %47 = dma.hbm_to_vmem [thread:$0]  %s2824_s2, 128, %s42_s10, [#allocation7], %s2591_s19, %s2591_s19, %s2592_s20  }
  0x16   :  { %s2593_s23 = smov [#allocation9]   ;;  %s2594_s25 = smov [#allocation3]  }
  0x17   :  { %s65_s24 = sshll.u32 %s2593_s23, 4  ;;  %s29_s26 = sshll.u32 %s2594_s25, 4  ;;  %s66_s24 = int_to_ptr.vmem [resolvable:$true] %s65_s24  ;;  %s30_s26 = int_to_ptr.vmem [resolvable:$true] %s29_s26 }
  0x18   :  { %s2424_s29 = scalar_lea.hbm %s2826_s4, 4096 }
  0x19   :  { %p2425_p8 = scmp.ne.s32.totalorder %s2826_s4, %s2424_s29  ;;  %p2428_p9 = scmp.lt.u32.totalorder %s2424_s29, %s2826_s4 }
  0x1b   :  { %p2430_p10 = pnand %p2428_p9, %p2425_p8 }
  0x1d   :  { %2433 = shalt.err (!%p2430_p10)
}
  0x1e   :  { %s2434_s2 = scalar_lea.vmem %s66_s24, 4096  ;;  %p2439_p12 = scmp.lt.s32.totalorder %s66_s24, %s66_s24 }
  0x1f   :  { %p2435_p11 = scmp.ne.s32.totalorder %s66_s24, %s2434_s2  ;;  %p2440_p13 = scmp.lt.s32.totalorder %s2434_s2, %s2434_s2 }
  0x21   :  { %p2441_p0 = por %p2440_p13, %p2439_p12 }
  0x23   :  { %p2442_p1 = pnand %p2441_p0, %p2435_p11 }
  0x25   :  { %2445 = shalt.err (!%p2442_p1)
}
  0x26   :  { %71 = dma.hbm_to_vmem [thread:$0]  %s2826_s4, 4096, %s66_s24, [#allocation10], %s2591_s19, %s2591_s19, %s2592_s20  }
  0x27   :  { %s2446_s17 = scalar_lea.hbm %s2823_s1, 256 }
  0x28   :  { %p2447_p2 = scmp.ne.s32.totalorder %s2823_s1, %s2446_s17  ;;  %p2450_p3 = scmp.lt.u32.totalorder %s2446_s17, %s2823_s1 }
  0x2a   :  { %p2452_p4 = pnand %p2450_p3, %p2447_p2 }
  0x2c   :  { %2455 = shalt.err (!%p2452_p4)
}
  0x2d   :  { %s2456_s25 = scalar_lea.vmem %s30_s26, 256  ;;  %p2461_p6 = scmp.lt.s32.totalorder %s30_s26, %s30_s26 }
  0x2e   :  { %p2457_p5 = scmp.ne.s32.totalorder %s30_s26, %s2456_s25  ;;  %p2462_p7 = scmp.lt.s32.totalorder %s2456_s25, %s2456_s25 }
  0x30   :  { %p2463_p8 = por %p2462_p7, %p2461_p6 }
  0x32   :  { %p2464_p9 = pnand %p2463_p8, %p2457_p5 }
  0x34   :  { %2467 = shalt.err (!%p2464_p9)
}
  0x35   :  { %s2595_s4 = smov 128   ;;  %s2596_s19 = smov 8  }
  0x36   :  { %35 = dma.hbm_to_vmem [thread:$0]  %s2823_s1, 256, %s30_s26, [#allocation4], %s2595_s4, %s2595_s4, %s2596_s19  }
  0x37   :  { %s2597_s27 = smov [#allocation8]   ;;  %s2468_s11 = scalar_lea.hbm %s2825_s3, 8192 }
  0x38   :  { %s53_s28 = sshll.u32 %s2597_s27, 4  ;;  %p2469_p10 = scmp.ne.s32.totalorder %s2825_s3, %s2468_s11  ;;  %s54_s28 = int_to_ptr.vmem [resolvable:$true] %s53_s28 }
  0x39   :  { %p2472_p11 = scmp.lt.u32.totalorder %s2468_s11, %s2825_s3 }
  0x3b   :  { %p2474_p12 = pnand %p2472_p11, %p2469_p10 }
  0x3d   :  { %2477 = shalt.err (!%p2474_p12)
}
  0x3e   :  { %s2478_s14 = scalar_lea.vmem %s54_s28, 8192  ;;  %p2483_p0 = scmp.lt.s32.totalorder %s54_s28, %s54_s28 }
  0x3f   :  { %p2479_p13 = scmp.ne.s32.totalorder %s54_s28, %s2478_s14  ;;  %p2484_p1 = scmp.lt.s32.totalorder %s2478_s14, %s2478_s14 }
  0x41   :  { %p2485_p2 = por %p2484_p1, %p2483_p0 }
  0x43   :  { %p2486_p3 = pnand %p2485_p2, %p2479_p13 }
  0x45   :  { %2489 = shalt.err (!%p2486_p3)
}
  0x46   :  { %s2598_s1 = smov 256   ;;  %s2599_s26 = smov 16  }
  0x47   :  { %59 = dma.hbm_to_vmem [thread:$0]  %s2825_s3, 8192, %s54_s28, [#allocation7], %s2598_s1, %s2598_s1, %s2599_s26  }
  0x48   :  { %s2600_s17 = smov [#allocation11]   ;;  %s2601_s21 = smov [#allocation12]  }
  0x49   :  { %s77_s18 = sshll.u32 %s2600_s17, 4  ;;  %s89_s22 = sshll.u32 %s2601_s21, 4  ;;  %s78_s18 = int_to_ptr.vmem [resolvable:$true] %s77_s18  ;;  %s2706_s22 = int_to_ptr.vmem [resolvable:$true] %s89_s22 }
  0x4a   :  { %s2490_s20 = scalar_lea.hbm %s2827_s5, 4096 }
  0x4b   :  { %p2491_p4 = scmp.ne.s32.totalorder %s2827_s5, %s2490_s20  ;;  %p2494_p5 = scmp.lt.u32.totalorder %s2490_s20, %s2827_s5 }
  0x4d   :  { %p2496_p6 = pnand %p2494_p5, %p2491_p4 }
  0x4f   :  { %2499 = shalt.err (!%p2496_p6)
}
  0x50   :  { %s2500_s3 = scalar_lea.vmem %s78_s18, 4096  ;;  %p2505_p8 = scmp.lt.s32.totalorder %s78_s18, %s78_s18 }
  0x51   :  { %p2501_p7 = scmp.ne.s32.totalorder %s78_s18, %s2500_s3  ;;  %p2506_p9 = scmp.lt.s32.totalorder %s2500_s3, %s2500_s3 }
  0x53   :  { %p2507_p10 = por %p2506_p9, %p2505_p8 }
  0x55   :  { %p2508_p11 = pnand %p2507_p10, %p2501_p7 }
  0x57   :  { %2511 = shalt.err (!%p2508_p11)
}
  0x58   :  { %83 = dma.hbm_to_vmem [thread:$0]  %s2827_s5, 4096, %s78_s18, [#allocation10], %s2598_s1, %s2598_s1, %s2599_s26  }
  0x59   :  { %s2512_s2 = scalar_lea.hbm %s2828_s6, 8192 }
  0x5a   :  { %p2513_p12 = scmp.ne.s32.totalorder %s2828_s6, %s2512_s2  ;;  %p2516_p13 = scmp.lt.u32.totalorder %s2512_s2, %s2828_s6 }
  0x5c   :  { %p2518_p0 = pnand %p2516_p13, %p2513_p12 }
  0x5e   :  { %2521 = shalt.err (!%p2518_p0)
}
  0x5f   :  { %s2522_s17 = scalar_lea.vmem %s2706_s22, 8192  ;;  %p2527_p2 = scmp.lt.s32.totalorder %s2706_s22, %s2706_s22 }
  0x60   :  { %p2523_p1 = scmp.ne.s32.totalorder %s2706_s22, %s2522_s17  ;;  %p2528_p3 = scmp.lt.s32.totalorder %s2522_s17, %s2522_s17 }
  0x62   :  { %p2529_p4 = por %p2528_p3, %p2527_p2 }
  0x64   :  { %p2530_p5 = pnand %p2529_p4, %p2523_p1 }
  0x66   :  { %2533 = shalt.err (!%p2530_p5)
}
  0x67   :  { %95 = dma.hbm_to_vmem [thread:$0]  %s2828_s6, 8192, %s2706_s22, [#allocation13], %s2595_s4, %s2595_s4, %s2596_s19  }
  0x68   :  { %2578 = dma.done.wait [#allocation4], 256  }
  0x69   :  { %2579 = vsyncadd [#allocation4], 4294967040 }
  0x6a   :  { %2580 = dma.done.wait [#allocation7], 8320  }
  0x6b   :  { %2581 = vsyncadd [#allocation7], 4294958976 }
  0x6c   :  { %2582 = dma.done.wait [#allocation10], 8192  }
  0x6d   :  { %2583 = vsyncadd [#allocation10], 4294959104 }
  0x6e   :  { %2584 = dma.done.wait [#allocation13], 8192  }
  0x6f   :  { %2585 = vsyncadd [#allocation13], 4294959104  ;;  %v2123_v0 = vld [vmem:[#allocation8 + $0x4] ss:$16 sps:$4 sm:$0xff]   ;;  %v2125_v1 = vld [vmem:[#allocation8] ss:$16 sps:$4 sm:$0xff]  }
  0x70   :  { %539 = vmatprep.subr.bf16.mxu1 %v2123_v0  ;;  %v2126_v2 = vld [vmem:[#allocation8 + $0x24] ss:$16 sps:$4 sm:$0xff]   ;;  %v2128_v3 = vld [vmem:[#allocation8 + $0x20] ss:$16 sps:$4 sm:$0xff]   ;;  %v2224_v30 = vld [vmem:[#allocation9 + $0x48] sm:$0xff]   ;;  %s2603_s20 = smov [#allocation15]  }
  0x71   :  { %540 = vmatpush1.bf16.msra.mxu1 %v2125_v1  ;;  %v2129_v4 = vld [vmem:[#allocation8 + $0x44] ss:$16 sps:$4 sm:$0xff]   ;;  %v2131_v5 = vld [vmem:[#allocation8 + $0x40] ss:$16 sps:$4 sm:$0xff]   ;;  %v2225_v31 = vld [vmem:[#allocation9 + $0x8] sm:$0xff]   ;;  %s1834_s24 = sshll.u32 %s2603_s20, 4  ;;  %s1835_s24 = int_to_ptr.vmem [resolvable:$true] %s1834_s24 }
  0x72   :  { %541 = vmatprep.subr.bf16.mxu1 %v2126_v2  ;;  %v2132_v6 = vld [vmem:[#allocation8 + $0x64] ss:$16 sps:$4 sm:$0xff]   ;;  %v2134_v7 = vld [vmem:[#allocation8 + $0x60] ss:$16 sps:$4 sm:$0xff]   ;;  %v2228_v36 = vld [vmem:[#allocation9 + $0x58] sm:$0xff]   ;;  %s2534_s27 = scalar_lea.vmem %s1835_s24, 256  ;;  %p2539_p7 = scmp.lt.s32.totalorder %s1835_s24, %s1835_s24 }
  0x73   :  { %v2135_v8 = vld [vmem:[#allocation8 + $0x84] ss:$16 sps:$4 sm:$0xff]   ;;  %v2137_v9 = vld [vmem:[#allocation8 + $0x80] ss:$16 sps:$4 sm:$0xff]   ;;  %v2229_v39 = vld [vmem:[#allocation9 + $0x18] sm:$0xff]   ;;  %p2535_p6 = scmp.ne.s32.totalorder %s1835_s24, %s2534_s27  ;;  %p2540_p8 = scmp.lt.s32.totalorder %s2534_s27, %s2534_s27 }
  0x74   :  { %v2138_v10 = vld [vmem:[#allocation8 + $0xa4] ss:$16 sps:$4 sm:$0xff]   ;;  %v2140_v11 = vld [vmem:[#allocation8 + $0xa0] ss:$16 sps:$4 sm:$0xff]   ;;  %v2176_v43 = vld [vmem:[#allocation8 + $0xc] ss:$16 sps:$4 sm:$0xff]  }
  0x75   :  { %542 = vmatpush1.bf16.msra.mxu1 %v2128_v3  ;;  %v2141_v12 = vld [vmem:[#allocation8 + $0xc4] ss:$16 sps:$4 sm:$0xff]   ;;  %v2143_v14 = vld [vmem:[#allocation8 + $0xc0] ss:$16 sps:$4 sm:$0xff]   ;;  %v2232_v44 = vld [vmem:[#allocation9 + $0x68] sm:$0xff]   ;;  %p2541_p9 = por %p2540_p8, %p2539_p7 }
  0x76   :  { %543 = vmatprep.subr.bf16.mxu1 %v2129_v4  ;;  %v2740_v13 = vld [vmem:[#allocation3 + $0x4] ss:$8 sps:$4 sm:$0xff]   ;;  %v2146_v16 = vld [vmem:[#allocation8 + $0xe0] ss:$16 sps:$4 sm:$0xff]   ;;  %v2174_v46 = vld [vmem:[#allocation8 + $0x8] ss:$16 sps:$4 sm:$0xff]  }
  0x77   :  { %v2144_v15 = vld [vmem:[#allocation8 + $0xe4] ss:$16 sps:$4 sm:$0xff]   ;;  %571 = vmatprep.mubr.bf16.mxu1 %v2740_v13  ;;  %v2149_v18 = vld [vmem:[#allocation8 + $0x100] ss:$16 sps:$4 sm:$0xff]   ;;  %v2179_v47 = vld [vmem:[#allocation8 + $0x2c] ss:$16 sps:$4 sm:$0xff]   ;;  %p2542_p10 = pnand %p2541_p9, %p2535_p6 }
  0x78   :  { %v2147_v17 = vld [vmem:[#allocation8 + $0x104] ss:$16 sps:$4 sm:$0xff]   ;;  %v2152_v20 = vld [vmem:[#allocation8 + $0x120] ss:$16 sps:$4 sm:$0xff]   ;;  %v2177_v48 = vld [vmem:[#allocation8 + $0x28] ss:$16 sps:$4 sm:$0xff]  }
  0x79   :  { %544 = vmatpush1.bf16.msra.mxu1 %v2131_v5  ;;  %v2150_v19 = vld [vmem:[#allocation8 + $0x124] ss:$16 sps:$4 sm:$0xff]   ;;  %v2155_v22 = vld [vmem:[#allocation8 + $0x140] ss:$16 sps:$4 sm:$0xff]   ;;  %v2182_v49 = vld [vmem:[#allocation8 + $0x4c] ss:$16 sps:$4 sm:$0xff]  }
  0x7a   :  { %545 = vmatprep.subr.bf16.mxu1 %v2132_v6  ;;  %v2153_v21 = vld [vmem:[#allocation8 + $0x144] ss:$16 sps:$4 sm:$0xff]   ;;  %v2158_v24 = vld [vmem:[#allocation8 + $0x160] ss:$16 sps:$4 sm:$0xff]   ;;  %v2180_v50 = vld [vmem:[#allocation8 + $0x48] ss:$16 sps:$4 sm:$0xff]  }
  0x7b   :  { %v2156_v23 = vld [vmem:[#allocation8 + $0x164] ss:$16 sps:$4 sm:$0xff]   ;;  %v2161_v27 = vld [vmem:[#allocation8 + $0x180] ss:$16 sps:$4 sm:$0xff]   ;;  %v2185_v51 = vld [vmem:[#allocation8 + $0x6c] ss:$16 sps:$4 sm:$0xff]  }
  0x7c   :  { %v2159_v25 = vld [vmem:[#allocation8 + $0x184] ss:$16 sps:$4 sm:$0xff]   ;;  %v2164_v33 = vld [vmem:[#allocation8 + $0x1a0] ss:$16 sps:$4 sm:$0xff]   ;;  %v2183_v52 = vld [vmem:[#allocation8 + $0x68] ss:$16 sps:$4 sm:$0xff]  }
  0x7d   :  { %546 = vmatpush1.bf16.msra.mxu1 %v2134_v7  ;;  %v2222_v26 = vld [vmem:[#allocation9 + $0x40] sm:$0xff]   ;;  %v2226_v32 = vld [vmem:[#allocation9 + $0x50] sm:$0xff]   ;;  %v2188_v53 = vld [vmem:[#allocation8 + $0x8c] ss:$16 sps:$4 sm:$0xff]  }
  0x7e   :  { %547 = vmatprep.subr.bf16.mxu1 %v2135_v8  ;;  %v2223_v28 = vld [vmem:[#allocation9] sm:$0xff]   ;;  %2056 = vmatprep.subr.bf16.mxu0 %v2222_v26  ;;  %v2227_v35 = vld [vmem:[#allocation9 + $0x10] sm:$0xff]   ;;  %v2186_v54 = vld [vmem:[#allocation8 + $0x88] ss:$16 sps:$4 sm:$0xff]  }
  0x7f   :  { %v2162_v29 = vld [vmem:[#allocation8 + $0x1a4] ss:$16 sps:$4 sm:$0xff]   ;;  %2057 = vmatpush3.bf16.msra.mxu0 %v2223_v28  ;;  %v2167_v37 = vld [vmem:[#allocation8 + $0x1c0] ss:$16 sps:$4 sm:$0xff]   ;;  %v2191_v55 = vld [vmem:[#allocation8 + $0xac] ss:$16 sps:$4 sm:$0xff]  }
  0x80   :  { %2058 = vmatprep.subr.bf16.mxu0 %v2224_v30  ;;  %v2165_v34 = vld [vmem:[#allocation8 + $0x1c4] ss:$16 sps:$4 sm:$0xff]   ;;  %v2170_v41 = vld [vmem:[#allocation8 + $0x1e0] ss:$16 sps:$4 sm:$0xff]   ;;  %v2189_v56 = vld [vmem:[#allocation8 + $0xa8] ss:$16 sps:$4 sm:$0xff]  }
  0x81   :  { %548 = vmatpush1.bf16.msra.mxu1 %v2137_v9  ;;  %v2168_v38 = vld [vmem:[#allocation8 + $0x1e4] ss:$16 sps:$4 sm:$0xff]   ;;  %v2743_v45 = vld [vmem:[#allocation3] ss:$8 sps:$4 sm:$0xff]   ;;  %v2194_v57 = vld [vmem:[#allocation8 + $0xcc] ss:$16 sps:$4 sm:$0xff]  }
  0x82   :  { %549 = vmatprep.subr.bf16.mxu1 %v2138_v10  ;;  %v2230_v40 = vld [vmem:[#allocation9 + $0x60] sm:$0xff]   ;;  %v2192_v58 = vld [vmem:[#allocation8 + $0xc8] ss:$16 sps:$4 sm:$0xff]   ;;  %v2197_v59 = vld [vmem:[#allocation8 + $0xec] ss:$16 sps:$4 sm:$0xff]  }
  0x83   :  { %2059 = vmatpush3.bf16.msra.mxu0 %v2225_v31  ;;  %v2231_v42 = vld [vmem:[#allocation9 + $0x20] sm:$0xff]   ;;  %v2195_v60 = vld [vmem:[#allocation8 + $0xe8] ss:$16 sps:$4 sm:$0xff]   ;;  %v2200_v61 = vld [vmem:[#allocation8 + $0x10c] ss:$16 sps:$4 sm:$0xff]  }
  0x84   :  { %2060 = vmatprep.subr.bf16.mxu0 %v2226_v32  ;;  %v2198_v62 = vld [vmem:[#allocation8 + $0x108] ss:$16 sps:$4 sm:$0xff]   ;;  %v2203_v63 = vld [vmem:[#allocation8 + $0x12c] ss:$16 sps:$4 sm:$0xff]   ;;  %v2246_v26 = vld [vmem:[#allocation9 + $0xe0] sm:$0xff]  }
  0x85   :  { %550 = vmatpush1.bf16.msra.mxu1 %v2140_v11  ;;  %v2201_v0 = vld [vmem:[#allocation8 + $0x128] ss:$16 sps:$4 sm:$0xff]   ;;  %v2206_v1 = vld [vmem:[#allocation8 + $0x14c] ss:$16 sps:$4 sm:$0xff]   ;;  %v2250_v30 = vld [vmem:[#allocation9 + $0xf0] sm:$0xff]  }
  0x86   :  { %551 = vmatprep.subr.bf16.mxu1 %v2141_v12  ;;  %v2204_v2 = vld [vmem:[#allocation8 + $0x148] ss:$16 sps:$4 sm:$0xff]   ;;  %v2209_v3 = vld [vmem:[#allocation8 + $0x16c] ss:$16 sps:$4 sm:$0xff]   ;;  %v2251_v31 = vld [vmem:[#allocation9 + $0xb0] sm:$0xff]  }
  0x87   :  { %2061 = vmatpush3.bf16.msra.mxu0 %v2227_v35  ;;  %v2207_v4 = vld [vmem:[#allocation8 + $0x168] ss:$16 sps:$4 sm:$0xff]   ;;  %v2212_v5 = vld [vmem:[#allocation8 + $0x18c] ss:$16 sps:$4 sm:$0xff]  }
  0x88   :  { %2062 = vmatprep.subr.bf16.mxu0 %v2228_v36  ;;  %v2210_v6 = vld [vmem:[#allocation8 + $0x188] ss:$16 sps:$4 sm:$0xff]   ;;  %v2215_v7 = vld [vmem:[#allocation8 + $0x1ac] ss:$16 sps:$4 sm:$0xff]  }
  0x89   :  { %552 = vmatpush1.bf16.msra.mxu1 %v2143_v14  ;;  %v2213_v8 = vld [vmem:[#allocation8 + $0x1a8] ss:$16 sps:$4 sm:$0xff]   ;;  %v2218_v9 = vld [vmem:[#allocation8 + $0x1cc] ss:$16 sps:$4 sm:$0xff]   ;;  %v2234_v14 = vld [vmem:[#allocation9 + $0x70] sm:$0xff]  }
  0x8a   :  { %553 = vmatprep.subr.bf16.mxu1 %v2144_v15  ;;  %v2216_v10 = vld [vmem:[#allocation8 + $0x1c8] ss:$16 sps:$4 sm:$0xff]   ;;  %v2221_v11 = vld [vmem:[#allocation8 + $0x1ec] ss:$16 sps:$4 sm:$0xff]   ;;  %v2235_v15 = vld [vmem:[#allocation9 + $0x30] sm:$0xff]  }
  0x8b   :  { %2063 = vmatpush3.bf16.msra.mxu0 %v2229_v39  ;;  %v2219_v12 = vld [vmem:[#allocation8 + $0x1e8] ss:$16 sps:$4 sm:$0xff]  }
  0x8c   :  { %2064 = vmatprep.subr.bf16.mxu0 %v2230_v40  ;;  %v2248_v28 = vld [vmem:[#allocation9 + $0xe8] sm:$0xff]   ;;  %v2252_v32 = vld [vmem:[#allocation9 + $0xf8] sm:$0xff]  }
  0x8d   :  { %554 = vmatpush1.bf16.msra.mxu1 %v2146_v16  ;;  %v2236_v16 = vld [vmem:[#allocation9 + $0x78] sm:$0xff]  }
  0x8e   :  { %555 = vmatprep.subr.bf16.mxu1 %v2147_v17  ;;  %v2237_v17 = vld [vmem:[#allocation9 + $0x38] sm:$0xff]  }
  0x8f   :  { %2065 = vmatpush3.bf16.msra.mxu0 %v2231_v42 }
  0x90   :  { %2066 = vmatprep.subr.bf16.mxu0 %v2232_v44 }
  0x91   :  { %556 = vmatpush1.bf16.msra.mxu1 %v2149_v18  ;;  %v2238_v18 = vld [vmem:[#allocation9 + $0xc0] sm:$0xff]  }
  0x92   :  { %557 = vmatprep.subr.bf16.mxu1 %v2150_v19  ;;  %v2239_v19 = vld [vmem:[#allocation9 + $0x80] sm:$0xff]  }
  0x95   :  { %558 = vmatpush1.bf16.msra.mxu1 %v2152_v20  ;;  %v2240_v20 = vld [vmem:[#allocation9 + $0xc8] sm:$0xff]  }
  0x96   :  { %559 = vmatprep.subr.bf16.mxu1 %v2153_v21  ;;  %v2241_v21 = vld [vmem:[#allocation9 + $0x88] sm:$0xff]  }
  0x99   :  { %560 = vmatpush1.bf16.msra.mxu1 %v2155_v22  ;;  %v2242_v22 = vld [vmem:[#allocation9 + $0xd0] sm:$0xff]  }
  0x9a   :  { %561 = vmatprep.subr.bf16.mxu1 %v2156_v23  ;;  %v2243_v23 = vld [vmem:[#allocation9 + $0x90] sm:$0xff]  }
  0x9d   :  { %562 = vmatpush1.bf16.msra.mxu1 %v2158_v24  ;;  %v2244_v24 = vld [vmem:[#allocation9 + $0xd8] sm:$0xff]  }
  0x9e   :  { %563 = vmatprep.subr.bf16.mxu1 %v2159_v25  ;;  %v2245_v25 = vld [vmem:[#allocation9 + $0x98] sm:$0xff]  }
  0xa1   :  { %564 = vmatpush1.bf16.msra.mxu1 %v2161_v27  ;;  %v2247_v27 = vld [vmem:[#allocation9 + $0xa0] sm:$0xff]  }
  0xa2   :  { %565 = vmatprep.subr.bf16.mxu1 %v2162_v29  ;;  %v2249_v29 = vld [vmem:[#allocation9 + $0xa8] sm:$0xff]  }
  0xa5   :  { %566 = vmatpush1.bf16.msra.mxu1 %v2164_v33  ;;  %v2253_v33 = vld [vmem:[#allocation9 + $0xb8] sm:$0xff]  }
  0xa6   :  { %567 = vmatprep.subr.bf16.mxu1 %v2165_v34  ;;  %v189_v34 = vlaneseq }
  0xa8   :  { %v2749_v35 = vshrl.u32 %v189_v34, 7 }
  0xa9   :  { %568 = vmatpush1.bf16.msra.mxu1 %v2167_v37  ;;  %v118_v37 = vld [vmem:[%s2829_s7] sm:$0xf] }
  0xaa   :  { %569 = vmatprep.subr.bf16.mxu1 %v2168_v38  ;;  %v2752_v36 = vsub.s32 0, %v2749_v35  ;;  %v2758_v38 = vsub.s32 1, %v2749_v35 }
  0xac   :  { %v192_v39 = vrot.slane %v118_v37, %v2752_v36  ;;  %v196_v40 = vrot.slane %v118_v37, %v2758_v38 }
  0xad   :  { %570 = vmatpush1.bf16.msra.mxu1 %v2170_v41 }
  0xae   :  { %582 = vmatprep.subr.bf16.mxu1 %v2176_v43 }
  0xb0   :  { %572 = vmatmul.mubr.bf16.vlgmr.msra.gmra.mrb[0].mxu1 %v2743_v45 }
  0xb1   :  { %583 = vmatpush1.bf16.msra.mxu1 %v2174_v46  ;;  %614 = vmatprep.mubr.bf16.mxu1 %v2740_v13  ;;  %v2233_v13 = vld [vmem:[#allocation9 + $0x28] sm:$0xff]  }
  0xb2   :  { %584 = vmatprep.subr.bf16.mxu1 %v2179_v47  ;;  %2067 = vmatpush3.bf16.msra.mxu0 %v2233_v13  ;;  %v2262_v13 = vld [vmem:[#allocation11 + $0x24] ss:$16 sps:$4 sm:$0xff]  }
  0xb3   :  { %2068 = vmatprep.subr.bf16.mxu0 %v2234_v14  ;;  %v2265_v14 = vld [vmem:[#allocation11 + $0x2c] ss:$16 sps:$4 sm:$0xff]  }
  0xb5   :  { %585 = vmatpush1.bf16.msra.mxu1 %v2177_v48 }
  0xb6   :  { %586 = vmatprep.subr.bf16.mxu1 %v2182_v49  ;;  %2069 = vmatpush3.bf16.msra.mxu0 %v2235_v15  ;;  %v2260_v15 = vld [vmem:[#allocation11 + $0x20] ss:$16 sps:$4 sm:$0xff]  }
  0xb7   :  { %2070 = vmatprep.subr.bf16.mxu0 %v2236_v16  ;;  %v2263_v16 = vld [vmem:[#allocation11 + $0x28] ss:$16 sps:$4 sm:$0xff]  }
  0xb9   :  { %587 = vmatpush1.bf16.msra.mxu1 %v2180_v50 }
  0xba   :  { %588 = vmatprep.subr.bf16.mxu1 %v2185_v51  ;;  %2071 = vmatpush3.bf16.msra.mxu0 %v2237_v17  ;;  %v2268_v17 = vld [vmem:[#allocation11 + $0x44] ss:$16 sps:$4 sm:$0xff]  }
  0xbd   :  { %589 = vmatpush1.bf16.msra.mxu1 %v2183_v52 }
  0xbe   :  { %590 = vmatprep.subr.bf16.mxu1 %v2188_v53 }
  0xc1   :  { %591 = vmatpush1.bf16.msra.mxu1 %v2186_v54 }
  0xc2   :  { %592 = vmatprep.subr.bf16.mxu1 %v2191_v55  ;;  %v199_v55 = vsub.s32 2, %v2749_v35 }
  0xc5   :  { %593 = vmatpush1.bf16.msra.mxu1 %v2189_v56  ;;  %v203_v56 = vsub.s32 3, %v2749_v35 }
  0xc6   :  { %594 = vmatprep.subr.bf16.mxu1 %v2194_v57  ;;  %v200_v57 = vrot.slane %v118_v37, %v199_v55 }
  0xc9   :  { %595 = vmatpush1.bf16.msra.mxu1 %v2192_v58  ;;  %v204_v58 = vrot.slane %v118_v37, %v203_v56  ;;  %v2295_v37 = vld [vmem:[#allocation11 + $0xcc] ss:$16 sps:$4 sm:$0xff]  }
  0xca   :  { %596 = vmatprep.subr.bf16.mxu1 %v2197_v59 }
  0xcd   :  { %597 = vmatpush1.bf16.msra.mxu1 %v2195_v60 }
  0xce   :  { %598 = vmatprep.subr.bf16.mxu1 %v2200_v61 }
  0xd1   :  { %599 = vmatpush1.bf16.msra.mxu1 %v2198_v62 }
  0xd2   :  { %600 = vmatprep.subr.bf16.mxu1 %v2203_v63 }
  0xd5   :  { %601 = vmatpush1.bf16.msra.mxu1 %v2201_v0 }
  0xd6   :  { %602 = vmatprep.subr.bf16.mxu1 %v2206_v1 }
  0xd9   :  { %603 = vmatpush1.bf16.msra.mxu1 %v2204_v2 }
  0xda   :  { %604 = vmatprep.subr.bf16.mxu1 %v2209_v3 }
  0xdd   :  { %605 = vmatpush1.bf16.msra.mxu1 %v2207_v4 }
  0xde   :  { %606 = vmatprep.subr.bf16.mxu1 %v2212_v5 }
  0xe1   :  { %607 = vmatpush1.bf16.msra.mxu1 %v2210_v6 }
  0xe2   :  { %608 = vmatprep.subr.bf16.mxu1 %v2215_v7 }
  0xe5   :  { %609 = vmatpush1.bf16.msra.mxu1 %v2213_v8 }
  0xe6   :  { %610 = vmatprep.subr.bf16.mxu1 %v2218_v9  ;;  %v2254_v9 = vld [vmem:[#allocation11] ss:$16 sps:$4 sm:$0xff]  }
  0xe9   :  { %611 = vmatpush1.bf16.msra.mxu1 %v2216_v10  ;;  %v2256_v10 = vld [vmem:[#allocation11 + $0x4] ss:$16 sps:$4 sm:$0xff]  }
  0xea   :  { %612 = vmatprep.subr.bf16.mxu1 %v2221_v11  ;;  %v2257_v11 = vld [vmem:[#allocation11 + $0x8] ss:$16 sps:$4 sm:$0xff]   ;;  %1222 = vmatprep.subr.bf16.mxu0 %v2256_v10 }
  0xed   :  { %613 = vmatpush1.bf16.msra.mxu1 %v2219_v12  ;;  %v2259_v12 = vld [vmem:[#allocation11 + $0xc] ss:$16 sps:$4 sm:$0xff]  }
  0xee   :  { %2078 = vmatprep.subr.bf16.mxu1 %v2238_v18  ;;  %v2271_v18 = vld [vmem:[#allocation11 + $0x4c] ss:$16 sps:$4 sm:$0xff]  }
  0xf0   :  { %615 = vmatmul.mubr.bf16.vlgmr.msra.gmra.mrb[4].mxu1 %v2743_v45 }
  0xf1   :  { %2079 = vmatpush3.bf16.msra.mxu1 %v2239_v19  ;;  %v2266_v19 = vld [vmem:[#allocation11 + $0x40] ss:$16 sps:$4 sm:$0xff]  }
  0xf2   :  { %2080 = vmatprep.subr.bf16.mxu1 %v2240_v20  ;;  %v2269_v20 = vld [vmem:[#allocation11 + $0x48] ss:$16 sps:$4 sm:$0xff]  }
  0xf5   :  { %2081 = vmatpush3.bf16.msra.mxu1 %v2241_v21  ;;  %v2274_v21 = vld [vmem:[#allocation11 + $0x64] ss:$16 sps:$4 sm:$0xff]  }
  0xf6   :  { %2082 = vmatprep.subr.bf16.mxu1 %v2242_v22  ;;  %v2277_v22 = vld [vmem:[#allocation11 + $0x6c] ss:$16 sps:$4 sm:$0xff]  }
  0xf9   :  { %2083 = vmatpush3.bf16.msra.mxu1 %v2243_v23  ;;  %v2272_v23 = vld [vmem:[#allocation11 + $0x60] ss:$16 sps:$4 sm:$0xff]  }
  0xfa   :  { %2084 = vmatprep.subr.bf16.mxu1 %v2244_v24  ;;  %v2275_v24 = vld [vmem:[#allocation11 + $0x68] ss:$16 sps:$4 sm:$0xff]  }
  0xfd   :  { %2085 = vmatpush3.bf16.msra.mxu1 %v2245_v25  ;;  %v2280_v25 = vld [vmem:[#allocation11 + $0x84] ss:$16 sps:$4 sm:$0xff]  }
  0xfe   :  { %2086 = vmatprep.subr.bf16.mxu1 %v2246_v26  ;;  %v2283_v26 = vld [vmem:[#allocation11 + $0x8c] ss:$16 sps:$4 sm:$0xff]  }
 0x101   :  { %2087 = vmatpush3.bf16.msra.mxu1 %v2247_v27  ;;  %v2278_v27 = vld [vmem:[#allocation11 + $0x80] ss:$16 sps:$4 sm:$0xff]  }
 0x102   :  { %2088 = vmatprep.subr.bf16.mxu1 %v2248_v28  ;;  %v2281_v28 = vld [vmem:[#allocation11 + $0x88] ss:$16 sps:$4 sm:$0xff]  }
 0x105   :  { %2089 = vmatpush3.bf16.msra.mxu1 %v2249_v29  ;;  %v2286_v29 = vld [vmem:[#allocation11 + $0xa4] ss:$16 sps:$4 sm:$0xff]  }
 0x106   :  { %2090 = vmatprep.subr.bf16.mxu1 %v2250_v30  ;;  %v2289_v30 = vld [vmem:[#allocation11 + $0xac] ss:$16 sps:$4 sm:$0xff]  }
 0x109   :  { %2091 = vmatpush3.bf16.msra.mxu1 %v2251_v31  ;;  %v2284_v31 = vld [vmem:[#allocation11 + $0xa0] ss:$16 sps:$4 sm:$0xff]  }
 0x10a   :  { %2092 = vmatprep.subr.bf16.mxu1 %v2252_v32  ;;  %v2287_v32 = vld [vmem:[#allocation11 + $0xa8] ss:$16 sps:$4 sm:$0xff]  }
 0x10d   :  { %2093 = vmatpush3.bf16.msra.mxu1 %v2253_v33  ;;  %v2292_v33 = vld [vmem:[#allocation11 + $0xc4] ss:$16 sps:$4 sm:$0xff]  }
 0x10e   :  { %1265 = vmatprep.subr.bf16.mxu1 %v2259_v12 }
 0x183   :  { %v573_v41 = vpop.f32.mrb[0].mxu1 }
 0x184   :  { %v574_v42 = vadd.f32 %v573_v41, %v192_v39  ;;  %v575_v43 = vpop.f32.mrb[1].mxu1  ;;  %v2298_v41 = vld [vmem:[#allocation11 + $0xe4] ss:$16 sps:$4 sm:$0xff]  }
 0x185   :  { %v576_v44 = vadd.f32 %v575_v43, %v196_v40  ;;  %v577_v45 = vpop.f32.mrb[2].mxu1  ;;  %v2296_v43 = vld [vmem:[#allocation11 + $0xe0] ss:$16 sps:$4 sm:$0xff]  }
 0x186   :  { %v625_v46 = vmax.f32 %v574_v42, 0.0  ;;  %v578_v47 = vadd.f32 %v577_v45, %v192_v39  ;;  %v579_v48 = vpop.f32.mrb[3].mxu1  ;;  %v2290_v39 = vld [vmem:[#allocation11 + $0xc0] ss:$16 sps:$4 sm:$0xff]   ;;  %v2301_v42 = vld [vmem:[#allocation11 + $0xec] ss:$16 sps:$4 sm:$0xff]  }
 0x187   :  { %v580_v49 = vadd.f32 %v579_v48, %v196_v40  ;;  %v626_v51 = vmax.f32 %v576_v44, 0.0  ;;  %v2293_v40 = vld [vmem:[#allocation11 + $0xc8] ss:$16 sps:$4 sm:$0xff]   ;;  %v2602_v45 = vmov 0  }
 0x188   :  { %v629_v50 = vmax.f32 %v578_v47, 0.0  ;;  %v2299_v44 = vld [vmem:[#allocation11 + $0xe8] ss:$16 sps:$4 sm:$0xff]  }
 0x189   :  { %v630_v52 = vmax.f32 %v580_v49, 0.0 }
 0x18a   :  { %v633_v53 = vpack.c.bf16 %v629_v50, %v625_v46  ;;  %v2304_v46 = vld [vmem:[#allocation12 + $0x4] ss:$8 sps:$4 sm:$0xff]  }
 0x18b   :  { %v634_v54 = vpack.c.bf16 %v630_v52, %v626_v51 }
 0x18d   :  { %931 = vmatprep.mubr.bf16.mxu0 %v634_v54 }
 0x18e   :  { %932 = vmatmul.mubr.bf16.vlgmr.msra.gmra.mrb[0].mxu0 %v633_v53  ;;  %v1919_v53 = vld [vmem:[%s2829_s7 + $0x4] ss:$0 sm:$0xff] }
 0x18f   :  { %1223 = vmatpush1.bf16.msra.mxu0 %v2254_v9  ;;  %1254 = vmatprep.mubr.bf16.mxu0 %v2602_v45  ;;  %v982_v9 = vand.u32 127, %v189_v34  ;;  %v2307_v34 = vld [vmem:[#allocation12 + $0x14] ss:$8 sps:$4 sm:$0xff]  }
 0x190   :  { %1224 = vmatprep.subr.bf16.mxu0 %v2262_v13 }
 0x191   :  { %vm989_vm0 = vcmp.ge.s32.totalorder %v982_v9, 20  ;;  %vm990_vm1 = vcmp.lt.s32.totalorder %v982_v9, 40  ;;  %vm1003_vm3 = vcmp.lt.s32.totalorder %v982_v9, 20 }
 0x192   :  { %vm991_vm2 = vmand %vm989_vm0, %vm990_vm1 }
 0x193   :  { %1225 = vmatpush1.bf16.msra.mxu0 %v2260_v15 }
 0x194   :  { %1226 = vmatprep.subr.bf16.mxu0 %v2268_v17 }
 0x197   :  { %1227 = vmatpush1.bf16.msra.mxu0 %v2266_v19 }
 0x198   :  { %1228 = vmatprep.subr.bf16.mxu0 %v2274_v21 }
 0x19b   :  { %1229 = vmatpush1.bf16.msra.mxu0 %v2272_v23  ;;  %v2302_v23 = vld [vmem:[#allocation12] ss:$8 sps:$4 sm:$0xff]  }
 0x19c   :  { %1230 = vmatprep.subr.bf16.mxu0 %v2280_v25  ;;  %v2305_v25 = vld [vmem:[#allocation12 + $0x10] ss:$8 sps:$4 sm:$0xff]  }
 0x19f   :  { %1231 = vmatpush1.bf16.msra.mxu0 %v2278_v27  ;;  %v2308_v27 = vld [vmem:[#allocation12 + $0x20] ss:$8 sps:$4 sm:$0xff]  }
 0x1a0   :  { %1232 = vmatprep.subr.bf16.mxu0 %v2286_v29  ;;  %v2311_v29 = vld [vmem:[#allocation12 + $0x30] ss:$8 sps:$4 sm:$0xff]  }
 0x1a3   :  { %1233 = vmatpush1.bf16.msra.mxu0 %v2284_v31  ;;  %v2314_v31 = vld [vmem:[#allocation12 + $0x40] ss:$8 sps:$4 sm:$0xff]  }
 0x1a4   :  { %1234 = vmatprep.subr.bf16.mxu0 %v2292_v33  ;;  %v2317_v33 = vld [vmem:[#allocation12 + $0x50] ss:$8 sps:$4 sm:$0xff]  }
 0x1a7   :  { %1235 = vmatpush1.bf16.msra.mxu0 %v2290_v39  ;;  %v2320_v39 = vld [vmem:[#allocation12 + $0x60] ss:$8 sps:$4 sm:$0xff]  }
 0x1a8   :  { %1236 = vmatprep.subr.bf16.mxu0 %v2298_v41  ;;  %v2323_v41 = vld [vmem:[#allocation12 + $0x70] ss:$8 sps:$4 sm:$0xff]  }
 0x1ab   :  { %1237 = vmatpush1.bf16.msra.mxu0 %v2296_v43  ;;  %v2326_v43 = vld [vmem:[#allocation12 + $0x80] ss:$8 sps:$4 sm:$0xff]  }
 0x1ac   :  { %1715 = vmatprep.subr.bf16.mxu0 %v2304_v46  ;;  %v2334_v46 = vld [vmem:[#allocation12 + $0xa4] ss:$8 sps:$4 sm:$0xff]  }
 0x1c3   :  { %v616_v59 = vpop.f32.mrb[4].mxu1 }
 0x1c4   :  { %v617_v60 = vadd.f32 %v616_v59, %v200_v57  ;;  %v618_v61 = vpop.f32.mrb[5].mxu1 }
 0x1c5   :  { %v619_v62 = vadd.f32 %v618_v61, %v204_v58  ;;  %v620_v63 = vpop.f32.mrb[6].mxu1 }
 0x1c6   :  { %v621_v0 = vadd.f32 %v620_v63, %v200_v57  ;;  %v622_v1 = vpop.f32.mrb[7].mxu1  ;;  %v627_v3 = vmax.f32 %v617_v60, 0.0 }
 0x1c7   :  { %v623_v2 = vadd.f32 %v622_v1, %v204_v58  ;;  %v628_v5 = vmax.f32 %v619_v62, 0.0 }
 0x1c8   :  { %v631_v4 = vmax.f32 %v621_v0, 0.0 }
 0x1c9   :  { %v632_v6 = vmax.f32 %v623_v2, 0.0 }
 0x1ca   :  { %v635_v7 = vpack.c.bf16 %v631_v4, %v627_v3 }
 0x1cb   :  { %v636_v8 = vpack.c.bf16 %v632_v6, %v628_v5  ;;  %v2053_v5 = vld [vmem:[#allocation6] sm:$0xff]  }
 0x1cc   :  { %v2055_v10 = vunpack.c.h.bf16 %v2053_v5 }
 0x1cd   :  { %972 = vmatprep.mubr.bf16.mxu1 %v636_v8  ;;  %v996_v8 = vstv %s2822_s0 }
 0x1ce   :  { %973 = vmatmul.mubr.bf16.vlgmr.msra.gmra.mrb[8].mxu1 %v635_v7  ;;  %v2054_v7 = vunpack.c.l.bf16 %v2053_v5  ;;  %v998_v12 = vmul.f32 %v2055_v10, %v996_v8 }
 0x1cf   :  { %1266 = vmatpush1.bf16.msra.mxu1 %v2257_v11  ;;  %1297 = vmatprep.mubr.bf16.mxu1 %v2602_v45  ;;  %v2329_v45 = vld [vmem:[#allocation12 + $0x90] ss:$8 sps:$4 sm:$0xff]  }
 0x1d0   :  { %1267 = vmatprep.subr.bf16.mxu1 %v2265_v14  ;;  %v997_v11 = vmul.f32 %v2054_v7, %v996_v8 }
 0x1d3   :  { %1268 = vmatpush1.bf16.msra.mxu1 %v2263_v16 }
 0x1d4   :  { %1269 = vmatprep.subr.bf16.mxu1 %v2271_v18 }
 0x1d7   :  { %1270 = vmatpush1.bf16.msra.mxu1 %v2269_v20 }
 0x1d8   :  { %1271 = vmatprep.subr.bf16.mxu1 %v2277_v22 }
 0x1db   :  { %1272 = vmatpush1.bf16.msra.mxu1 %v2275_v24 }
 0x1dc   :  { %1273 = vmatprep.subr.bf16.mxu1 %v2283_v26  ;;  %v2310_v26 = vld [vmem:[#allocation12 + $0x24] ss:$8 sps:$4 sm:$0xff]  }
 0x1df   :  { %1274 = vmatpush1.bf16.msra.mxu1 %v2281_v28  ;;  %v2313_v28 = vld [vmem:[#allocation12 + $0x34] ss:$8 sps:$4 sm:$0xff]  }
 0x1e0   :  { %1275 = vmatprep.subr.bf16.mxu1 %v2289_v30  ;;  %v2316_v30 = vld [vmem:[#allocation12 + $0x44] ss:$8 sps:$4 sm:$0xff]  }
 0x1e3   :  { %1276 = vmatpush1.bf16.msra.mxu1 %v2287_v32  ;;  %v2319_v32 = vld [vmem:[#allocation12 + $0x54] ss:$8 sps:$4 sm:$0xff]  }
 0x1e4   :  { %1277 = vmatprep.subr.bf16.mxu1 %v2295_v37  ;;  %v2322_v37 = vld [vmem:[#allocation12 + $0x64] ss:$8 sps:$4 sm:$0xff]  }
 0x1e7   :  { %1278 = vmatpush1.bf16.msra.mxu1 %v2293_v40  ;;  %v2325_v40 = vld [vmem:[#allocation12 + $0x74] ss:$8 sps:$4 sm:$0xff]  }
 0x1e8   :  { %1279 = vmatprep.subr.bf16.mxu1 %v2301_v42  ;;  %v2328_v42 = vld [vmem:[#allocation12 + $0x84] ss:$8 sps:$4 sm:$0xff]  }
 0x1eb   :  { %1280 = vmatpush1.bf16.msra.mxu1 %v2299_v44  ;;  %v2331_v44 = vld [vmem:[#allocation12 + $0x94] ss:$8 sps:$4 sm:$0xff]  }
 0x261   :  { %v2072_v47 = vpop.f32.mrb[0].mxu0 }
 0x262   :  { %v2073_v48 = vpop.f32.mrb[1].mxu0 }
 0x263   :  { %v2074_v49 = vadd.f32 %v2073_v48, %v2072_v47  ;;  %v2075_v50 = vpop.f32.mrb[2].mxu0  ;;  %v2332_v47 = vld [vmem:[#allocation12 + $0xa0] ss:$8 sps:$4 sm:$0xff]   ;;  %v2337_v48 = vld [vmem:[#allocation12 + $0xb4] ss:$8 sps:$4 sm:$0xff]  }
 0x264   :  { %v2076_v51 = vpop.f32.mrb[3].mxu0 }
 0x265   :  { %v2077_v52 = vadd.f32 %v2076_v51, %v2075_v50  ;;  %v934_v58 = vadd.f32 %v2074_v49, %v1919_v53  ;;  %v2335_v49 = vld [vmem:[#allocation12 + $0xb0] ss:$8 sps:$4 sm:$0xff]   ;;  %v2340_v50 = vld [vmem:[#allocation12 + $0xc4] ss:$8 sps:$4 sm:$0xff]   ;;  %v2338_v51 = vld [vmem:[#allocation12 + $0xc0] ss:$8 sps:$4 sm:$0xff]  }
 0x267   :  { %v937_v62 = vadd.f32 %v2077_v52, %v1919_v53  ;;  %v2343_v52 = vld [vmem:[#allocation12 + $0xd4] ss:$8 sps:$4 sm:$0xff]   ;;  %v2341_v53 = vld [vmem:[#allocation12 + $0xd0] ss:$8 sps:$4 sm:$0xff]  }
 0x2a1   :  { %v2094_v54 = vpop.f32.mrb[8].mxu1 }
 0x2a2   :  { %v2095_v57 = vpop.f32.mrb[9].mxu1 }
 0x2a3   :  { %v2096_v59 = vadd.f32 %v2095_v57, %v2094_v54  ;;  %v2097_v60 = vpop.f32.mrb[10].mxu1  ;;  %v2346_v54 = vld [vmem:[#allocation12 + $0xe4] ss:$8 sps:$4 sm:$0xff]   ;;  %v2344_v57 = vld [vmem:[#allocation12 + $0xe0] ss:$8 sps:$4 sm:$0xff]  }
 0x2a4   :  { %v2098_v61 = vpop.f32.mrb[11].mxu1 }
 0x2a5   :  { %v975_v63 = vadd.f32 %v2096_v59, %v934_v58  ;;  %v2099_v0 = vadd.f32 %v2098_v61, %v2097_v60  ;;  %v2349_v58 = vld [vmem:[#allocation12 + $0xf4] ss:$8 sps:$4 sm:$0xff]   ;;  %v2347_v59 = vld [vmem:[#allocation12 + $0xf0] ss:$8 sps:$4 sm:$0xff]   ;;  %v2352_v60 = vld [vmem:[#allocation12 + $0x104] ss:$8 sps:$4 sm:$0xff]  }
 0x2a6   :  { %v120_v61 = vld [vmem:[%s2829_s7 + $0x5] sm:$0xf] }
 0x2a7   :  { %v983_v1 = vmul.f32 0.5, %v975_v63  ;;  %1815 = vst [vmem:[#allocation15] sm:$0xff] %v975_v63  ;;  %v978_v2 = vadd.f32 %v2099_v0, %v937_v62  ;;  %v1004_v18 = vsel %vm1003_vm3, %v975_v63, 0.0  ;;  %v1045_v62 = vrot.slane %v120_v61, %v2752_v36 }
 0x2a8   :  { %v1053_v63 = vrot.slane %v120_v61, %v199_v55  ;;  %v1049_v0 = vrot.slane %v120_v61, %v2758_v38 }
 0x2a9   :  { %v985_v3 = vmul.f32 1.442695, %v983_v1  ;;  %v984_v4 = vmul.f32 0.5, %v978_v2  ;;  %1816 = vst [vmem:[#allocation15 + $0x8] sm:$0xff] %v978_v2  ;;  %v1005_v20 = vsel %vm1003_vm3, %v978_v2, 0.0  ;;  %v1057_v1 = vrot.slane %v120_v61, %v203_v56 }
 0x2aa   :  { %v2397_v61 = vld [vmem:[#allocation12 + $0x1f4] ss:$8 sps:$4 sm:$0xff]  }
 0x2ab   :  { %2398 = vpow2.f32 %v985_v3  ;;  %v987_v6 = vmul.f32 1.442695, %v984_v4 }
 0x2ad   :  { %2400 = vpow2.f32 %v987_v6 }
 0x2b5   :  { %v2399_v13 = vpop.eup %2398 }
 0x2b6   :  { %v999_v14 = vmul.f32 %v2399_v13, %v997_v11 }
 0x2b7   :  { %v2401_v15 = vpop.eup %2400 }
 0x2b8   :  { %v1001_v16 = vsel %vm991_vm2, %v999_v14, 0.0  ;;  %v1000_v17 = vmul.f32 %v2401_v15, %v998_v12 }
 0x2b9   :  { %v1006_v21 = vadd.f32 %v1004_v18, %v1001_v16 }
 0x2ba   :  { %v1002_v19 = vsel %vm991_vm2, %v1000_v17, 0.0 }
 0x2bb   :  { %v1007_v22 = vadd.f32 %v1005_v20, %v1002_v19 }
 0x2bd   :  { %v1008_v24 = vpack.c.bf16 %v1007_v22, %v1006_v21 }
 0x2bf   :  { %1255 = vmatmul.mubr.bf16.vlgmr.msra.gmra.mrb[4].mxu0 %v1008_v24  ;;  %1298 = vmatmul.mubr.bf16.vlgmr.msra.gmra.mrb[12].mxu1 %v1008_v24 }
 0x2c0   :  { %1716 = vmatpush1.bf16.msra.mxu0 %v2302_v23 }
 0x2c1   :  { %1717 = vmatprep.subr.bf16.mxu0 %v2307_v34 }
 0x2c4   :  { %1718 = vmatpush1.bf16.msra.mxu0 %v2305_v25 }
 0x2c5   :  { %1719 = vmatprep.subr.bf16.mxu0 %v2310_v26  ;;  %v2350_v26 = vld [vmem:[#allocation12 + $0x100] ss:$8 sps:$4 sm:$0xff]  }
 0x2c8   :  { %1720 = vmatpush1.bf16.msra.mxu0 %v2308_v27  ;;  %v2355_v27 = vld [vmem:[#allocation12 + $0x114] ss:$8 sps:$4 sm:$0xff]  }
 0x2c9   :  { %1721 = vmatprep.subr.bf16.mxu0 %v2313_v28  ;;  %v2353_v28 = vld [vmem:[#allocation12 + $0x110] ss:$8 sps:$4 sm:$0xff]  }
 0x2cc   :  { %1722 = vmatpush1.bf16.msra.mxu0 %v2311_v29  ;;  %v2358_v29 = vld [vmem:[#allocation12 + $0x124] ss:$8 sps:$4 sm:$0xff]  }
 0x2cd   :  { %1723 = vmatprep.subr.bf16.mxu0 %v2316_v30  ;;  %v2356_v30 = vld [vmem:[#allocation12 + $0x120] ss:$8 sps:$4 sm:$0xff]  }
 0x2d0   :  { %1724 = vmatpush1.bf16.msra.mxu0 %v2314_v31  ;;  %v2361_v31 = vld [vmem:[#allocation12 + $0x134] ss:$8 sps:$4 sm:$0xff]  }
 0x2d1   :  { %1725 = vmatprep.subr.bf16.mxu0 %v2319_v32  ;;  %v2359_v32 = vld [vmem:[#allocation12 + $0x130] ss:$8 sps:$4 sm:$0xff]  }
 0x2d4   :  { %1726 = vmatpush1.bf16.msra.mxu0 %v2317_v33  ;;  %v2364_v33 = vld [vmem:[#allocation12 + $0x144] ss:$8 sps:$4 sm:$0xff]  }
 0x2d5   :  { %1727 = vmatprep.subr.bf16.mxu0 %v2322_v37  ;;  %v2362_v37 = vld [vmem:[#allocation12 + $0x140] ss:$8 sps:$4 sm:$0xff]  }
 0x2d8   :  { %1728 = vmatpush1.bf16.msra.mxu0 %v2320_v39  ;;  %v2367_v39 = vld [vmem:[#allocation12 + $0x154] ss:$8 sps:$4 sm:$0xff]  }
 0x2d9   :  { %1729 = vmatprep.subr.bf16.mxu0 %v2325_v40  ;;  %v2365_v40 = vld [vmem:[#allocation12 + $0x150] ss:$8 sps:$4 sm:$0xff]  }
 0x2dc   :  { %1730 = vmatpush1.bf16.msra.mxu0 %v2323_v41  ;;  %v2370_v41 = vld [vmem:[#allocation12 + $0x164] ss:$8 sps:$4 sm:$0xff]  }
 0x2dd   :  { %1731 = vmatprep.subr.bf16.mxu0 %v2328_v42  ;;  %v2368_v42 = vld [vmem:[#allocation12 + $0x160] ss:$8 sps:$4 sm:$0xff]  }
 0x2e0   :  { %1732 = vmatpush1.bf16.msra.mxu0 %v2326_v43  ;;  %v2373_v43 = vld [vmem:[#allocation12 + $0x174] ss:$8 sps:$4 sm:$0xff]  }
 0x2e1   :  { %1733 = vmatprep.subr.bf16.mxu0 %v2331_v44  ;;  %v2371_v44 = vld [vmem:[#allocation12 + $0x170] ss:$8 sps:$4 sm:$0xff]  }
 0x2e4   :  { %1734 = vmatpush1.bf16.msra.mxu0 %v2329_v45  ;;  %v2376_v45 = vld [vmem:[#allocation12 + $0x184] ss:$8 sps:$4 sm:$0xff]  }
 0x2e5   :  { %1735 = vmatprep.subr.bf16.mxu0 %v2334_v46  ;;  %v2374_v46 = vld [vmem:[#allocation12 + $0x180] ss:$8 sps:$4 sm:$0xff]  }
 0x2e8   :  { %1736 = vmatpush1.bf16.msra.mxu0 %v2332_v47  ;;  %v2379_v47 = vld [vmem:[#allocation12 + $0x194] ss:$8 sps:$4 sm:$0xff]  }
 0x2e9   :  { %1737 = vmatprep.subr.bf16.mxu0 %v2337_v48  ;;  %v2377_v48 = vld [vmem:[#allocation12 + $0x190] ss:$8 sps:$4 sm:$0xff]  }
 0x2ec   :  { %1738 = vmatpush1.bf16.msra.mxu0 %v2335_v49  ;;  %v2382_v49 = vld [vmem:[#allocation12 + $0x1a4] ss:$8 sps:$4 sm:$0xff]  }
 0x2ed   :  { %1739 = vmatprep.subr.bf16.mxu0 %v2340_v50  ;;  %v2380_v50 = vld [vmem:[#allocation12 + $0x1a0] ss:$8 sps:$4 sm:$0xff]  }
 0x2f0   :  { %1740 = vmatpush1.bf16.msra.mxu0 %v2338_v51  ;;  %v2385_v51 = vld [vmem:[#allocation12 + $0x1b4] ss:$8 sps:$4 sm:$0xff]  }
 0x2f1   :  { %1741 = vmatprep.subr.bf16.mxu0 %v2343_v52  ;;  %v2383_v52 = vld [vmem:[#allocation12 + $0x1b0] ss:$8 sps:$4 sm:$0xff]  }
 0x2f4   :  { %1742 = vmatpush1.bf16.msra.mxu0 %v2341_v53  ;;  %v2388_v53 = vld [vmem:[#allocation12 + $0x1c4] ss:$8 sps:$4 sm:$0xff]  }
 0x2f5   :  { %1743 = vmatprep.subr.bf16.mxu0 %v2346_v54  ;;  %v2386_v54 = vld [vmem:[#allocation12 + $0x1c0] ss:$8 sps:$4 sm:$0xff]  }
 0x2f8   :  { %1744 = vmatpush1.bf16.msra.mxu0 %v2344_v57  ;;  %v2391_v57 = vld [vmem:[#allocation12 + $0x1d4] ss:$8 sps:$4 sm:$0xff]  }
 0x2f9   :  { %1745 = vmatprep.subr.bf16.mxu0 %v2349_v58  ;;  %v2389_v58 = vld [vmem:[#allocation12 + $0x1d0] ss:$8 sps:$4 sm:$0xff]  }
 0x2fc   :  { %1746 = vmatpush1.bf16.msra.mxu0 %v2347_v59  ;;  %v2394_v59 = vld [vmem:[#allocation12 + $0x1e4] ss:$8 sps:$4 sm:$0xff]  }
 0x2fd   :  { %1758 = vmatprep.subr.bf16.mxu0 %v2352_v60  ;;  %v2392_v60 = vld [vmem:[#allocation12 + $0x1e0] ss:$8 sps:$4 sm:$0xff]  }
 0x392   :  { %v1256_v2 = vpop.f32.mrb[4].mxu0  ;;  %v1299_v3 = vpop.f32.mrb[12].mxu1 }
 0x393   :  { %v1257_v4 = vadd.f32 %v1256_v2, %v1045_v62  ;;  %v1300_v5 = vadd.f32 %v1299_v3, %v1053_v63  ;;  %v1258_v6 = vpop.f32.mrb[5].mxu0  ;;  %v1301_v7 = vpop.f32.mrb[13].mxu1 }
 0x394   :  { %v1259_v8 = vadd.f32 %v1258_v6, %v1049_v0  ;;  %v1302_v9 = vadd.f32 %v1301_v7, %v1057_v1  ;;  %v1260_v10 = vpop.f32.mrb[6].mxu0  ;;  %v1303_v11 = vpop.f32.mrb[14].mxu1 }
 0x395   :  { %v1261_v12 = vadd.f32 %v1260_v10, %v1045_v62  ;;  %v1304_v13 = vadd.f32 %v1303_v11, %v1053_v63  ;;  %v1262_v14 = vpop.f32.mrb[7].mxu0  ;;  %v1305_v15 = vpop.f32.mrb[15].mxu1  ;;  %v1308_v17 = vmax.f32 %v1257_v4, 0.0  ;;  %v1310_v18 = vmax.f32 %v1300_v5, 0.0  ;;  %v2395_v62 = vld [vmem:[#allocation12 + $0x1f0] ss:$8 sps:$4 sm:$0xff]  }
 0x396   :  { %v1263_v55 = vadd.f32 %v1262_v14, %v1049_v0  ;;  %v1306_v16 = vadd.f32 %v1305_v15, %v1057_v1  ;;  %v1309_v19 = vmax.f32 %v1259_v8, 0.0  ;;  %v1311_v20 = vmax.f32 %v1302_v9, 0.0 }
 0x397   :  { %v1312_v35 = vmax.f32 %v1261_v12, 0.0  ;;  %v1314_v56 = vmax.f32 %v1304_v13, 0.0 }
 0x398   :  { %v1313_v21 = vmax.f32 %v1263_v55, 0.0  ;;  %v1315_v22 = vmax.f32 %v1306_v16, 0.0 }
 0x399   :  { %v1316_v23 = vpack.c.bf16 %v1312_v35, %v1308_v17  ;;  %v2784_v24 = vpack.c.bf16 %v1314_v56, %v1310_v18 }
 0x39a   :  { %v1317_v34 = vpack.c.bf16 %v1313_v21, %v1309_v19  ;;  %v1319_v25 = vpack.c.bf16 %v1315_v22, %v1311_v20 }
 0x39c   :  { %1747 = vmatprep.mubr.bf16.mxu0 %v1317_v34 }
 0x39d   :  { %1748 = vmatmul.mubr.bf16.vlgmr.msra.gmra.mrb[8].mxu0 %v1316_v23 }
 0x39e   :  { %1759 = vmatpush1.bf16.msra.mxu0 %v2350_v26  ;;  %1790 = vmatprep.mubr.bf16.mxu0 %v1319_v25 }
 0x39f   :  { %1760 = vmatprep.subr.bf16.mxu0 %v2355_v27 }
 0x3a2   :  { %1761 = vmatpush1.bf16.msra.mxu0 %v2353_v28 }
 0x3a3   :  { %1762 = vmatprep.subr.bf16.mxu0 %v2358_v29 }
 0x3a6   :  { %1763 = vmatpush1.bf16.msra.mxu0 %v2356_v30 }
 0x3a7   :  { %1764 = vmatprep.subr.bf16.mxu0 %v2361_v31 }
 0x3aa   :  { %1765 = vmatpush1.bf16.msra.mxu0 %v2359_v32 }
 0x3ab   :  { %1766 = vmatprep.subr.bf16.mxu0 %v2364_v33 }
 0x3ae   :  { %1767 = vmatpush1.bf16.msra.mxu0 %v2362_v37 }
 0x3af   :  { %1768 = vmatprep.subr.bf16.mxu0 %v2367_v39 }
 0x3b2   :  { %1769 = vmatpush1.bf16.msra.mxu0 %v2365_v40 }
 0x3b3   :  { %1770 = vmatprep.subr.bf16.mxu0 %v2370_v41 }
 0x3b6   :  { %1771 = vmatpush1.bf16.msra.mxu0 %v2368_v42 }
 0x3b7   :  { %1772 = vmatprep.subr.bf16.mxu0 %v2373_v43 }
 0x3ba   :  { %1773 = vmatpush1.bf16.msra.mxu0 %v2371_v44 }
 0x3bb   :  { %1774 = vmatprep.subr.bf16.mxu0 %v2376_v45 }
 0x3be   :  { %1775 = vmatpush1.bf16.msra.mxu0 %v2374_v46 }
 0x3bf   :  { %1776 = vmatprep.subr.bf16.mxu0 %v2379_v47 }
 0x3c2   :  { %1777 = vmatpush1.bf16.msra.mxu0 %v2377_v48 }
 0x3c3   :  { %1778 = vmatprep.subr.bf16.mxu0 %v2382_v49 }
 0x3c6   :  { %1779 = vmatpush1.bf16.msra.mxu0 %v2380_v50 }
 0x3c7   :  { %1780 = vmatprep.subr.bf16.mxu0 %v2385_v51 }
 0x3ca   :  { %1781 = vmatpush1.bf16.msra.mxu0 %v2383_v52 }
 0x3cb   :  { %1782 = vmatprep.subr.bf16.mxu0 %v2388_v53 }
 0x3ce   :  { %1783 = vmatpush1.bf16.msra.mxu0 %v2386_v54 }
 0x3cf   :  { %1784 = vmatprep.subr.bf16.mxu0 %v2391_v57 }
 0x3d2   :  { %1785 = vmatpush1.bf16.msra.mxu0 %v2389_v58 }
 0x3d3   :  { %1786 = vmatprep.subr.bf16.mxu0 %v2394_v59 }
 0x3d6   :  { %1787 = vmatpush1.bf16.msra.mxu0 %v2392_v60 }
 0x3d7   :  { %1788 = vmatprep.subr.bf16.mxu0 %v2397_v61 }
 0x3da   :  { %1789 = vmatpush1.bf16.msra.mxu0 %v2395_v62 }
 0x3dd   :  { %1791 = vmatmul.mubr.bf16.vlgmr.msra.gmra.mrb[8].mxu0 %v2784_v24 }
 0x3de   :  { %2545 = shalt.err (!%p2542_p10)
}
 0x3df   :  { %s2546_s3 = scalar_lea.hbm %s2831_s9, 256 }
 0x3e0   :  { %p2547_p11 = scmp.ne.s32.totalorder %s2831_s9, %s2546_s3  ;;  %p2550_p12 = scmp.lt.u32.totalorder %s2546_s3, %s2831_s9 }
 0x3e2   :  { %p2552_p13 = pnand %p2550_p12, %p2547_p11 }
 0x3e4   :  { %2555 = shalt.err (!%p2552_p13)
}
 0x3e5   :  { %1840 = dma.vmem_to_hbm [thread:$0]  %s1835_s24, 256, %s2831_s9, [#allocation16], %s2595_s4, %s2595_s4, %s2596_s19  }
 0x3e6   :  { %v121_v63 = vld [vmem:[%s2829_s7 + $0x9] sm:$0x3]  ;;  %s2604_s16 = smov [#allocation14]  }
 0x3e7   :  { %v1388_v0 = vrot.slane %v121_v63, %v2752_v36  ;;  %v1392_v1 = vrot.slane %v121_v63, %v2758_v38  ;;  %s1822_s17 = sshll.u32 %s2604_s16, 4  ;;  %s1823_s17 = int_to_ptr.vmem [resolvable:$true] %s1822_s17 }
 0x3e8   :  { %s2556_s7 = scalar_lea.vmem %s1823_s17, 256  ;;  %p2561_p1 = scmp.lt.s32.totalorder %s1823_s17, %s1823_s17 }
 0x3e9   :  { %p2557_p0 = scmp.ne.s32.totalorder %s1823_s17, %s2556_s7  ;;  %p2562_p2 = scmp.lt.s32.totalorder %s2556_s7, %s2556_s7 }
 0x3eb   :  { %p2563_p3 = por %p2562_p2, %p2561_p1 }
 0x3ed   :  { %p2564_p4 = pnand %p2563_p3, %p2557_p0 }
 0x4b0   :  { %v1792_v2 = vpop.f32.mrb[8].mxu0 }
 0x4b1   :  { %v2100_v3 = vadd.f32 %v1792_v2, %v1388_v0  ;;  %v1794_v4 = vpop.f32.mrb[9].mxu0 }
 0x4b2   :  { %v2101_v5 = vadd.f32 %v1794_v4, %v1392_v1  ;;  %v1796_v6 = vpop.f32.mrb[10].mxu0 }
 0x4b3   :  { %v2102_v7 = vadd.f32 %v1796_v6, %v1388_v0  ;;  %v1798_v8 = vpop.f32.mrb[11].mxu0 }
 0x4b4   :  { %v2050_v9 = vpack.c.bf16 %v2101_v5, %v2100_v3  ;;  %v2103_v10 = vadd.f32 %v1798_v8, %v1392_v1 }
 0x4b6   :  { %1813 = vst [vmem:[#allocation14] sm:$0xff] %v2050_v9  ;;  %v2051_v11 = vpack.c.bf16 %v2103_v10, %v2102_v7 }
 0x4b8   :  { %1814 = vst [vmem:[#allocation14 + $0x8] sm:$0xff] %v2051_v11 }
 0x4b9   :  { %2567 = shalt.err (!%p2564_p4)
}
 0x4ba   :  { %s2568_s1 = scalar_lea.hbm %s2830_s8, 256 }
 0x4bb   :  { %p2569_p5 = scmp.ne.s32.totalorder %s2830_s8, %s2568_s1  ;;  %p2572_p6 = scmp.lt.u32.totalorder %s2568_s1, %s2830_s8 }
 0x4bd   :  { %p2574_p7 = pnand %p2572_p6, %p2569_p5 }
 0x4bf   :  { %2577 = shalt.err (!%p2574_p7)
}
 0x4c0   :  { %1828 = dma.vmem_to_hbm [thread:$0]  %s1823_s17, 256, %s2830_s8, [#allocation5], %s2595_s4, %s2595_s4, %s2596_s19  }
 0x4c1   :  { %2586 = dma.done.wait [#allocation5], 256  }
 0x4c2   :  { %2587 = vsyncadd [#allocation5], 4294967040 }
 0x4c3   :  { %2588 = dma.done.wait [#allocation16], 256  }
 0x4c4   :  { %2589 = vsyncadd [#allocation16], 4294967040 }
 0x4c5   :  { %1847 = vsyncpa [#allocation4], 1 }
 0x4c6   :  { %1848 = vsyncpa [#allocation7], 1 }
 0x4c7   :  { %1849 = vsyncpa [#allocation10], 1 }
 0x4c8   :  { %1850 = vsyncpa [#allocation13], 1 }
 0x4c9   :  { %1851 = vsyncpa [#allocation5], 1 }
 0x4ca   :  { %1852 = vsyncpa [#allocation16], 1 }

</bundles_post_ra>
